<compile_context>
chip_gen: v5e
topology: v5e:2x2
jax: 0.10.0
libtpu: 0.0.40
codegen_flags: <defaults>
</compile_context>

<pallas_src>
from functools import partial

import numpy as np
import jax
import jax.numpy as jnp
from jax.experimental import pallas as pl
from jax.experimental.pallas import tpu as pltpu

IN_DIM = 32      # opt.word_vec_size
MEM_DIM = 32     # opt.rnn_size // num_directions (brnn=False -> 32)
VOCAB = 16
MAX_LENGTH = 10


# ---------------------------------------------------------------------------
# Fused tree-encoder kernel (one tree per grid step)
# ---------------------------------------------------------------------------
def _tree_kernel(num_leaves, max_length, levels,
                 tok_ref,                         # VMEM (L, 1) int32
                 emb_ref,                         # VMEM (VOCAB, IN_DIM)
                 w_leaf_ref, b_leaf_ref,          # VMEM (IN_DIM, 2M), (1, 2M)
                 w_comp_ref, b_comp_ref,          # VMEM (4M, 4M), (1, 4M)
                 out_ref,                         # VMEM out (max_length, M)
                 root_ref):                       # VMEM out (1, 2M) = [c_root | h_root]
    M = MEM_DIM
    L = num_leaves
    V = emb_ref.shape[0]

    # ---- leaf phase: one-hot embedding gather + fused [cx|ox] matmul -------
    lane_v = jax.lax.broadcasted_iota(jnp.int32, (L, V), 1)
    onehot = (tok_ref[...] == lane_v).astype(jnp.float32)            # (L, V)
    x = jnp.dot(onehot, emb_ref[...], preferred_element_type=jnp.float32)   # (L, IN)
    z = (jnp.dot(x, w_leaf_ref[...], preferred_element_type=jnp.float32)
         + b_leaf_ref[...])                                          # (L, 2M) = [c | o_logits]

    # single tanh pass: tanh(c) on the c half, sigmoid(o)=0.5*tanh(o/2)+0.5 on the o half
    lane2 = jax.lax.broadcasted_iota(jnp.int32, (L, 2 * M), 1)
    is_o = lane2 >= M
    t = jnp.tanh(jnp.where(is_o, 0.5 * z, z))
    c_leaf = z[:, :M]                                                # raw cell state
    h_leaf = (0.5 * t[:, M:] + 0.5) * t[:, :M]                       # sigmoid(o) * tanh(c)

    out_ref[0:L, :] = h_leaf                                         # leaf outputs, in order
    if max_length > L:                                               # zero only the pad rows
        out_ref[L:max_length, :] = jnp.zeros((max_length - L, M), jnp.float32)

    # ---- composer phase: level-parallel walk, state carried in registers ---
    w_comp = w_comp_ref[...]            # (4M, 4M), zero rows at the lc/rc positions (hoisted)
    b_comp = b_comp_ref[...]            # (1, 4M)                              (hoisted)
    lane4 = jax.lax.broadcasted_iota(jnp.int32, (L, 4 * M), 1)
    is_sig = lane4 < 3 * M              # sigmoid lanes [i|lf|rf], tanh lanes [u] (hoisted)

    # state row layout: [c | h]; at the start of level d the real nodes of the
    # previous level sit at rows j * shift (shift = 2**d'), other rows are
    # harmless don't-care values (bounded, so no overflow).
    state = jnp.concatenate([c_leaf, h_leaf], axis=1)                # (L, 2M)
    shift = 1
    for _ in range(levels):
        # static sublane rotate: partner[r] = state[r + shift]  (wrap rows are don't-care)
        partner = jnp.concatenate([state[shift:, :], state[:shift, :]], axis=0)
        pairs = jnp.concatenate([state, partner], axis=1)            # (L, 4M) = [lc|lh|rc|rh]

        # single fused gate matmul, K = 4M = 128: gates = lh@Wl + rh@Wr + b
        gates = (jnp.dot(pairs, w_comp, preferred_element_type=jnp.float32)
                 + b_comp)                                           # (L, 4M) = [i|lf|rf|u]

        # one tanh pass for sigmoid(i,lf,rf) and tanh(u)
        tg = jnp.tanh(jnp.where(is_sig, 0.5 * gates, gates))
        act = jnp.where(is_sig, 0.5 * tg + 0.5, tg)

        i_g = act[:, 0:M]
        lf = act[:, M:2 * M]
        rf = act[:, 2 * M:3 * M]
        u = act[:, 3 * M:4 * M]
        lc = pairs[:, 0:M]
        rc = pairs[:, 2 * M:3 * M]

        cc = i_g * u + lf * lc + rf * rc
        hh = jnp.tanh(cc)                                            # gate_output=False path
        state = jnp.concatenate([cc, hh], axis=1)                    # new level at rows j*2*shift
        shift *= 2

    root_ref[...] = state[0:1, :]                                    # root lives at row 0


def make_tree_encoder(num_leaves, max_length, batch):
    """Builds a jitted batched encoder for complete binary trees of `num_leaves` leaves."""
    assert num_leaves >= 2 and (num_leaves & (num_leaves - 1)) == 0, \
        "kernel is specialized to complete binary trees (power-of-two leaves)"
    levels = num_leaves.bit_length() - 1
    M = MEM_DIM

    call = pl.pallas_call(
        partial(_tree_kernel, num_leaves, max_length, levels),
        grid=(batch,),
        in_specs=[
            pl.BlockSpec((None, num_leaves, 1), lambda b: (b, 0, 0)),    # token ids (per tree)
            pl.BlockSpec((VOCAB, IN_DIM), lambda b: (0, 0)),             # embedding table
            pl.BlockSpec((IN_DIM, 2 * M), lambda b: (0, 0)),             # leaf [cx|ox]
            pl.BlockSpec((1, 2 * M), lambda b: (0, 0)),
            pl.BlockSpec((4 * M, 4 * M), lambda b: (0, 0)),              # composer stacked gates
            pl.BlockSpec((1, 4 * M), lambda b: (0, 0)),
        ],
        out_specs=[
            pl.BlockSpec((None, max_length, M), lambda b: (b, 0, 0)),    # padded leaf outputs
            pl.BlockSpec((None, 1, 2 * M), lambda b: (b, 0, 0)),         # root [c | h]
        ],
        out_shape=[
            jax.ShapeDtypeStruct((batch, max_length, M), jnp.float32),
            jax.ShapeDtypeStruct((batch, 1, 2 * M), jnp.float32),
        ],
        compiler_params=pltpu.CompilerParams(dimension_semantics=("parallel",)),
    )

    @jax.jit
    def encode(token_ids, params, emb_table):
        tok = token_ids.astype(jnp.int32).reshape(batch, num_leaves, 1)
        out, root = call(tok, emb_table,
                         params["w_leaf"], params["b_leaf"],
                         params["w_comp"], params["b_comp"])
        output = out[:, :, None, :]                                   # (B, max_length, 1, M)
        c_root = root[:, 0, :M].reshape(batch, 1, 1, M)
        h_root = root[:, 0, M:].reshape(batch, 1, 1, M)
        return output, (c_root, h_root)

    return encode


# ---------------------------------------------------------------------------
# Parameters (deterministic synthetic init; mimics nn.Linear shapes)
# ---------------------------------------------------------------------------
def init_params(key):
    ks = jax.random.split(key, 24)
    k_it = iter(ks)

    def linear(fan_in, fan_out):
        kw, kb = next(k_it), next(k_it)
        bound = 1.0 / np.sqrt(fan_in)
        w = jax.random.uniform(kw, (fan_in, fan_out), jnp.float32, -bound, bound)
        b = jax.random.uniform(kb, (fan_out,), jnp.float32, -bound, bound)
        return w, b

    # leaf module: cx, ox : Linear(in_dim, mem_dim)
    wcx, bcx = linear(IN_DIM, MEM_DIM)
    wox, box = linear(IN_DIM, MEM_DIM)

    # composer: 8 Linear(mem_dim, mem_dim) gates
    w_ilh, b_ilh = linear(MEM_DIM, MEM_DIM)
    w_irh, b_irh = linear(MEM_DIM, MEM_DIM)
    w_lflh, b_lflh = linear(MEM_DIM, MEM_DIM)
    w_lfrh, b_lfrh = linear(MEM_DIM, MEM_DIM)
    w_rflh, b_rflh = linear(MEM_DIM, MEM_DIM)
    w_rfrh, b_rfrh = linear(MEM_DIM, MEM_DIM)
    w_ulh, b_ulh = linear(MEM_DIM, MEM_DIM)
    w_urh, b_urh = linear(MEM_DIM, MEM_DIM)

    M = MEM_DIM
    wl_f = jnp.concatenate([w_ilh, w_lflh, w_rflh, w_ulh], axis=1)    # (M, 4M)
    wr_f = jnp.concatenate([w_irh, w_lfrh, w_rfrh, w_urh], axis=1)    # (M, 4M)
    zeros = jnp.zeros((M, 4 * M), jnp.float32)
    fused = {
        # fused leaf weight: [cx | ox] -> (in, 2*mem)
        "w_leaf": jnp.concatenate([wcx, wox], axis=1),
        "b_leaf": jnp.concatenate([bcx, box])[None, :],
        # stacked composer weight acting on a [lc|lh|rc|rh] pair row (K = 4M):
        # zero rows for lc/rc, Wl rows for lh, Wr rows for rh.
        "w_comp": jnp.concatenate([zeros, wl_f, zeros, wr_f], axis=0),
        "b_comp": jnp.concatenate(
            [b_ilh + b_irh, b_lflh + b_lfrh, b_rflh + b_rfrh, b_ulh + b_urh])[None, :],
    }
    raw = {
        "wcx": wcx, "bcx": bcx, "wox": wox, "box": box,
        "w_ilh": w_ilh, "b_ilh": b_ilh, "w_irh": w_irh, "b_irh": b_irh,
        "w_lflh": w_lflh, "b_lflh": b_lflh, "w_lfrh": w_lfrh, "b_lfrh": b_lfrh,
        "w_rflh": w_rflh, "b_rflh": b_rflh, "w_rfrh": w_rfrh, "b_rfrh": b_rfrh,
        "w_ulh": w_ulh, "b_ulh": b_ulh, "w_urh": w_urh, "b_urh": b_urh,
    }
    return fused, raw


# ---------------------------------------------------------------------------
# Tree structure (for the reference recursion only)
# ---------------------------------------------------------------------------
class Tree:
    def __init__(self, content=None, children=None):
        self.content = content
        self.children = children if children is not None else []
        self.parent = None
        for ch in self.children:
            ch.parent = self


def build_complete_tree(leaf_ids):
    nodes = [Tree(content=i) for i in leaf_ids]
    while len(nodes) > 1:
        nxt = []
        for j in range(0, len(nodes), 2):
            nxt.append(Tree(children=[nodes[j], nodes[j + 1]]))
        nodes = nxt
    return nodes[0]


# ---------------------------------------------------------------------------
# Pure-numpy reference (mirrors the PyTorch recursion with un-fused weights)
# ---------------------------------------------------------------------------
def _sig(x):
    return 1.0 / (1.0 + np.exp(-x))


def reference_forward(tree, lengths, raw, emb):
    raw = {k: np.asarray(v, np.float64) for k, v in raw.items()}
    emb = np.asarray(emb, np.float64)

    def rec(node):
        if not node.children:
            x = emb[node.content][None, :]
            c = x @ raw["wcx"] + raw["bcx"]
            o = _sig(x @ raw["wox"] + raw["box"])
            h = o * np.tanh(c)
            return h, (c, h)
        lo, (lc, lh) = rec(node.children[0])
        ro, (rc, rh) = rec(node.children[1])
        i = _sig(lh @ raw["w_ilh"] + raw["b_ilh"] + rh @ raw["w_irh"] + raw["b_irh"])
        lf = _sig(lh @ raw["w_lflh"] + raw["b_lflh"] + rh @ raw["w_lfrh"] + raw["b_lfrh"])
        rf = _sig(lh @ raw["w_rflh"] + raw["b_rflh"] + rh @ raw["w_rfrh"] + raw["b_rfrh"])
        u = np.tanh(lh @ raw["w_ulh"] + raw["b_ulh"] + rh @ raw["w_urh"] + raw["b_urh"])
        c = i * u + lf * lc + rf * rc
        h = np.tanh(c)
        output = np.concatenate([lo, ro], axis=0)
        if node.parent is None:
            max_length = int(np.max(lengths))
            output = output[:, None, :]
            supl = max_length - output.shape[0]
            if supl > 0:
                output = np.concatenate(
                    [output, np.zeros((supl, 1, output.shape[2]))], axis=0)
            c = c[:, None, :]
            h = h[:, None, :]
        return output, (c, h)

    return rec(tree)


# ---------------------------------------------------------------------------
if __name__ == "__main__":
    key = jax.random.PRNGKey(0)
    k_emb, k_par, k_tok = jax.random.split(key, 3)

    # TODO(synk): gensim Word2Vec lookup replaced by a deterministic synthetic
    #             embedding table keyed by integer token ids (OOV->zeros path
    #             not modeled).
    emb_table = jax.random.normal(k_emb, (VOCAB, IN_DIM), jnp.float32)
    params, raw_params = init_params(k_par)

    B = 2                  # batch of trees, split across cores via the parallel grid axis
    L = 8                  # leaves per (complete binary) tree
    lengths = np.array([MAX_LENGTH, L], dtype=np.int32)
    max_length = int(np.max(lengths))

    token_ids = jax.random.randint(k_tok, (B, L), 0, VOCAB, dtype=jnp.int32)

    encoder = make_tree_encoder(L, max_length, B)
    output, (c_root, h_root) = encoder(token_ids, params, emb_table)

    jax.block_until_ready(output)
    jax.block_until_ready(c_root)
    jax.block_until_ready(h_root)

    assert output.shape == (B, max_length, 1, MEM_DIM)
    assert c_root.shape == (B, 1, 1, MEM_DIM)
    assert h_root.shape == (B, 1, 1, MEM_DIM)

    # Numerical cross-check against the literal (un-fused) recursion, per tree.
    # Tolerance tightened 5x vs. before; kept at 1e-2 (not ~1e-4) to stay safe
    # if the MXU runs the f32 matmuls via reduced-precision bf16 passes under
    # default precision.
    TOL = 1e-2
    tok_np = np.asarray(token_ids)
    for b in range(B):
        tree = build_complete_tree([int(t) for t in tok_np[b]])
        ref_out, (ref_c, ref_h) = reference_forward(tree, lengths, raw_params, emb_table)
        assert np.max(np.abs(np.asarray(output[b], np.float64) - ref_out)) < TOL
        assert np.max(np.abs(np.asarray(c_root[b], np.float64) - ref_c)) < TOL
        assert np.max(np.abs(np.asarray(h_root[b], np.float64) - ref_h)) < TOL

    print("KERNEL_OK")
</pallas_src>

<mosaic_0001>
module attributes {stable_mosaic.version = 11 : i64} {
  func.func @_tree_kernel(%arg0: i32, %arg1: memref<1x8x1xi32, #tpu.memory_space<vmem>>, %arg2: memref<16x32xf32, #tpu.memory_space<vmem>>, %arg3: memref<32x64xf32, #tpu.memory_space<vmem>>, %arg4: memref<1x64xf32, #tpu.memory_space<vmem>>, %arg5: memref<128x128xf32, #tpu.memory_space<vmem>>, %arg6: memref<1x128xf32, #tpu.memory_space<vmem>>, %arg7: memref<1x10x32xf32, #tpu.memory_space<vmem>>, %arg8: memref<1x1x64xf32, #tpu.memory_space<vmem>>) attributes {dimension_semantics = [#tpu.dimension_semantics<parallel>], iteration_bounds = array<i64: 2>, scalar_prefetch = 0 : i64, scratch_operands = 0 : i64, tpu.core_type = #tpu.core_type<tc>, window_params = [{transform_indices = @transform_0, window_bounds = array<i64: 1, 8, 1>}, {pipeline_mode = #tpu.pipeline_mode<synchronous>, transform_indices = @transform_1, window_bounds = array<i64: 16, 32>}, {pipeline_mode = #tpu.pipeline_mode<synchronous>, transform_indices = @transform_2, window_bounds = array<i64: 32, 64>}, {pipeline_mode = #tpu.pipeline_mode<synchronous>, transform_indices = @transform_3, window_bounds = array<i64: 1, 64>}, {pipeline_mode = #tpu.pipeline_mode<synchronous>, transform_indices = @transform_4, window_bounds = array<i64: 128, 128>}, {pipeline_mode = #tpu.pipeline_mode<synchronous>, transform_indices = @transform_5, window_bounds = array<i64: 1, 128>}, {transform_indices = @transform_6, window_bounds = array<i64: 1, 10, 32>}, {transform_indices = @transform_7, window_bounds = array<i64: 1, 1, 64>}]} {
    %0 = tpu.iota {dimensions = array<i32: 1>} : vector<8x16xi32>
    %c0 = arith.constant 0 : index
    %c0_0 = arith.constant 0 : index
    %c0_1 = arith.constant 0 : index
    %1 = vector.load %arg1[%c0, %c0_0, %c0_1] : memref<1x8x1xi32, #tpu.memory_space<vmem>>, vector<1x8x1xi32>
    %2 = vector.shape_cast %1 : vector<1x8x1xi32> to vector<8x1xi32>
    %3 = vector.broadcast %2 : vector<8x1xi32> to vector<8x16xi32>
    %4 = arith.cmpi eq, %3, %0 : vector<8x16xi32>
    %5 = arith.extui %4 : vector<8x16xi1> to vector<8x16xi32>
    %6 = arith.sitofp %5 : vector<8x16xi32> to vector<8x16xf32>
    %c0_2 = arith.constant 0 : index
    %c0_3 = arith.constant 0 : index
    %7 = vector.load %arg2[%c0_2, %c0_3] : memref<16x32xf32, #tpu.memory_space<vmem>>, vector<16x32xf32>
    %cst = arith.constant dense<0.000000e+00> : vector<8x32xf32>
    %8 = tpu.matmul %6, %7, %cst {dimension_numbers = #tpu.dot_dimension_numbers<[1], [0], [0], [1], [0, 0, 1, 1], [], []>} : vector<8x16xf32>, vector<16x32xf32>, vector<8x32xf32> -> vector<8x32xf32>
    %c0_4 = arith.constant 0 : index
    %c0_5 = arith.constant 0 : index
    %9 = vector.load %arg3[%c0_4, %c0_5] : memref<32x64xf32, #tpu.memory_space<vmem>>, vector<32x64xf32>
    %cst_6 = arith.constant dense<0.000000e+00> : vector<8x64xf32>
    %10 = tpu.matmul %8, %9, %cst_6 {dimension_numbers = #tpu.dot_dimension_numbers<[1], [0], [0], [1], [0, 0, 1, 1], [], []>} : vector<8x32xf32>, vector<32x64xf32>, vector<8x64xf32> -> vector<8x64xf32>
    %c0_7 = arith.constant 0 : index
    %c0_8 = arith.constant 0 : index
    %11 = vector.load %arg4[%c0_7, %c0_8] : memref<1x64xf32, #tpu.memory_space<vmem>>, vector<1x64xf32>
    %12 = vector.broadcast %11 : vector<1x64xf32> to vector<8x64xf32>
    %13 = arith.addf %10, %12 : vector<8x64xf32>
    %14 = tpu.iota {dimensions = array<i32: 1>} : vector<8x64xi32>
    %c32_i32 = arith.constant 32 : i32
    %15 = vector.broadcast %c32_i32 : i32 to vector<8x64xi32>
    %16 = arith.cmpi sge, %14, %15 : vector<8x64xi32>
    %cst_9 = arith.constant 5.000000e-01 : f32
    %17 = vector.broadcast %cst_9 : f32 to vector<8x64xf32>
    %18 = arith.mulf %17, %13 : vector<8x64xf32>
    %19 = arith.select %16, %18, %13 : vector<8x64xi1>, vector<8x64xf32>
    %20 = math.tanh %19 : vector<8x64xf32>
    %21 = vector.extract_strided_slice %13 {offsets = [0, 0], sizes = [8, 32], strides = [1, 1]} : vector<8x64xf32> to vector<8x32xf32>
    %22 = vector.extract_strided_slice %20 {offsets = [0, 32], sizes = [8, 32], strides = [1, 1]} : vector<8x64xf32> to vector<8x32xf32>
    %cst_10 = arith.constant 5.000000e-01 : f32
    %23 = vector.broadcast %cst_10 : f32 to vector<8x32xf32>
    %24 = arith.mulf %23, %22 : vector<8x32xf32>
    %cst_11 = arith.constant 5.000000e-01 : f32
    %25 = vector.broadcast %cst_11 : f32 to vector<8x32xf32>
    %26 = arith.addf %24, %25 : vector<8x32xf32>
    %27 = vector.extract_strided_slice %20 {offsets = [0, 0], sizes = [8, 32], strides = [1, 1]} : vector<8x64xf32> to vector<8x32xf32>
    %28 = arith.mulf %26, %27 : vector<8x32xf32>
    %c0_12 = arith.constant 0 : index
    %c0_13 = arith.constant 0 : index
    %c0_14 = arith.constant 0 : index
    %29 = vector.load %arg7[%c0_12, %c0_13, %c0_14] : memref<1x10x32xf32, #tpu.memory_space<vmem>>, vector<1x8x32xf32>
    %30 = vector.shape_cast %29 : vector<1x8x32xf32> to vector<8x32xf32>
    %31 = vector.shape_cast %28 : vector<8x32xf32> to vector<1x8x32xf32>
    tpu.vector_store %arg7[%c0_12, %c0_13, %c0_14], %31 {strides = array<i32>} : memref<1x10x32xf32, #tpu.memory_space<vmem>>, vector<1x8x32xf32>,
    %cst_15 = arith.constant 0.000000e+00 : f32
    %32 = vector.broadcast %cst_15 : f32 to vector<2x32xf32>
    %c0_16 = arith.constant 0 : index
    %c8 = arith.constant 8 : index
    %c0_17 = arith.constant 0 : index
    %33 = vector.load %arg7[%c0_16, %c8, %c0_17] : memref<1x10x32xf32, #tpu.memory_space<vmem>>, vector<1x2x32xf32>
    %34 = vector.shape_cast %33 : vector<1x2x32xf32> to vector<2x32xf32>
    %35 = vector.shape_cast %32 : vector<2x32xf32> to vector<1x2x32xf32>
    tpu.vector_store %arg7[%c0_16, %c8, %c0_17], %35 {strides = array<i32>} : memref<1x10x32xf32, #tpu.memory_space<vmem>>, vector<1x2x32xf32>,
    %c0_18 = arith.constant 0 : index
    %c0_19 = arith.constant 0 : index
    %36 = vector.load %arg5[%c0_18, %c0_19] : memref<128x128xf32, #tpu.memory_space<vmem>>, vector<128x128xf32>
    %c0_20 = arith.constant 0 : index
    %c0_21 = arith.constant 0 : index
    %37 = vector.load %arg6[%c0_20, %c0_21] : memref<1x128xf32, #tpu.memory_space<vmem>>, vector<1x128xf32>
    %38 = tpu.iota {dimensions = array<i32: 1>} : vector<8x128xi32>
    %c96_i32 = arith.constant 96 : i32
    %39 = vector.broadcast %c96_i32 : i32 to vector<8x128xi32>
    %40 = arith.cmpi slt, %38, %39 : vector<8x128xi32>
    %41 = tpu.concatenate %21, %28 in 1 : vector<8x32xf32>, vector<8x32xf32> -> vector<8x64xf32>
    %42 = vector.extract_strided_slice %41 {offsets = [1, 0], sizes = [7, 64], strides = [1, 1]} : vector<8x64xf32> to vector<7x64xf32>
    %43 = vector.extract_strided_slice %41 {offsets = [0, 0], sizes = [1, 64], strides = [1, 1]} : vector<8x64xf32> to vector<1x64xf32>
    %44 = tpu.concatenate %42, %43 in 0 : vector<7x64xf32>, vector<1x64xf32> -> vector<8x64xf32>
    %45 = tpu.concatenate %41, %44 in 1 : vector<8x64xf32>, vector<8x64xf32> -> vector<8x128xf32>
    %cst_22 = arith.constant dense<0.000000e+00> : vector<8x128xf32>
    %46 = tpu.matmul %45, %36, %cst_22 {dimension_numbers = #tpu.dot_dimension_numbers<[1], [0], [0], [1], [0, 0, 1, 1], [], []>} : vector<8x128xf32>, vector<128x128xf32>, vector<8x128xf32> -> vector<8x128xf32>
    %47 = vector.broadcast %37 : vector<1x128xf32> to vector<8x128xf32>
    %48 = arith.addf %46, %47 : vector<8x128xf32>
    %cst_23 = arith.constant 5.000000e-01 : f32
    %49 = vector.broadcast %cst_23 : f32 to vector<8x128xf32>
    %50 = arith.mulf %49, %48 : vector<8x128xf32>
    %51 = arith.select %40, %50, %48 : vector<8x128xi1>, vector<8x128xf32>
    %52 = math.tanh %51 : vector<8x128xf32>
    %cst_24 = arith.constant 5.000000e-01 : f32
    %53 = vector.broadcast %cst_24 : f32 to vector<8x128xf32>
    %54 = arith.mulf %53, %52 : vector<8x128xf32>
    %cst_25 = arith.constant 5.000000e-01 : f32
    %55 = vector.broadcast %cst_25 : f32 to vector<8x128xf32>
    %56 = arith.addf %54, %55 : vector<8x128xf32>
    %57 = arith.select %40, %56, %52 : vector<8x128xi1>, vector<8x128xf32>
    %58 = vector.extract_strided_slice %57 {offsets = [0, 0], sizes = [8, 32], strides = [1, 1]} : vector<8x128xf32> to vector<8x32xf32>
    %59 = vector.extract_strided_slice %57 {offsets = [0, 32], sizes = [8, 32], strides = [1, 1]} : vector<8x128xf32> to vector<8x32xf32>
    %60 = vector.extract_strided_slice %57 {offsets = [0, 64], sizes = [8, 32], strides = [1, 1]} : vector<8x128xf32> to vector<8x32xf32>
    %61 = vector.extract_strided_slice %57 {offsets = [0, 96], sizes = [8, 32], strides = [1, 1]} : vector<8x128xf32> to vector<8x32xf32>
    %62 = vector.extract_strided_slice %45 {offsets = [0, 0], sizes = [8, 32], strides = [1, 1]} : vector<8x128xf32> to vector<8x32xf32>
    %63 = vector.extract_strided_slice %45 {offsets = [0, 64], sizes = [8, 32], strides = [1, 1]} : vector<8x128xf32> to vector<8x32xf32>
    %64 = arith.mulf %58, %61 : vector<8x32xf32>
    %65 = arith.mulf %59, %62 : vector<8x32xf32>
    %66 = arith.addf %64, %65 : vector<8x32xf32>
    %67 = arith.mulf %60, %63 : vector<8x32xf32>
    %68 = arith.addf %66, %67 : vector<8x32xf32>
    %69 = math.tanh %68 : vector<8x32xf32>
    %70 = tpu.concatenate %68, %69 in 1 : vector<8x32xf32>, vector<8x32xf32> -> vector<8x64xf32>
    %71 = vector.extract_strided_slice %70 {offsets = [2, 0], sizes = [6, 64], strides = [1, 1]} : vector<8x64xf32> to vector<6x64xf32>
    %72 = vector.extract_strided_slice %70 {offsets = [0, 0], sizes = [2, 64], strides = [1, 1]} : vector<8x64xf32> to vector<2x64xf32>
    %73 = tpu.concatenate %71, %72 in 0 : vector<6x64xf32>, vector<2x64xf32> -> vector<8x64xf32>
    %74 = tpu.concatenate %70, %73 in 1 : vector<8x64xf32>, vector<8x64xf32> -> vector<8x128xf32>
    %cst_26 = arith.constant dense<0.000000e+00> : vector<8x128xf32>
    %75 = tpu.matmul %74, %36, %cst_26 {dimension_numbers = #tpu.dot_dimension_numbers<[1], [0], [0], [1], [0, 0, 1, 1], [], []>} : vector<8x128xf32>, vector<128x128xf32>, vector<8x128xf32> -> vector<8x128xf32>
    %76 = vector.broadcast %37 : vector<1x128xf32> to vector<8x128xf32>
    %77 = arith.addf %75, %76 : vector<8x128xf32>
    %cst_27 = arith.constant 5.000000e-01 : f32
    %78 = vector.broadcast %cst_27 : f32 to vector<8x128xf32>
    %79 = arith.mulf %78, %77 : vector<8x128xf32>
    %80 = arith.select %40, %79, %77 : vector<8x128xi1>, vector<8x128xf32>
    %81 = math.tanh %80 : vector<8x128xf32>
    %cst_28 = arith.constant 5.000000e-01 : f32
    %82 = vector.broadcast %cst_28 : f32 to vector<8x128xf32>
    %83 = arith.mulf %82, %81 : vector<8x128xf32>
    %cst_29 = arith.constant 5.000000e-01 : f32
    %84 = vector.broadcast %cst_29 : f32 to vector<8x128xf32>
    %85 = arith.addf %83, %84 : vector<8x128xf32>
    %86 = arith.select %40, %85, %81 : vector<8x128xi1>, vector<8x128xf32>
    %87 = vector.extract_strided_slice %86 {offsets = [0, 0], sizes = [8, 32], strides = [1, 1]} : vector<8x128xf32> to vector<8x32xf32>
    %88 = vector.extract_strided_slice %86 {offsets = [0, 32], sizes = [8, 32], strides = [1, 1]} : vector<8x128xf32> to vector<8x32xf32>
    %89 = vector.extract_strided_slice %86 {offsets = [0, 64], sizes = [8, 32], strides = [1, 1]} : vector<8x128xf32> to vector<8x32xf32>
    %90 = vector.extract_strided_slice %86 {offsets = [0, 96], sizes = [8, 32], strides = [1, 1]} : vector<8x128xf32> to vector<8x32xf32>
    %91 = vector.extract_strided_slice %74 {offsets = [0, 0], sizes = [8, 32], strides = [1, 1]} : vector<8x128xf32> to vector<8x32xf32>
    %92 = vector.extract_strided_slice %74 {offsets = [0, 64], sizes = [8, 32], strides = [1, 1]} : vector<8x128xf32> to vector<8x32xf32>
    %93 = arith.mulf %87, %90 : vector<8x32xf32>
    %94 = arith.mulf %88, %91 : vector<8x32xf32>
    %95 = arith.addf %93, %94 : vector<8x32xf32>
    %96 = arith.mulf %89, %92 : vector<8x32xf32>
    %97 = arith.addf %95, %96 : vector<8x32xf32>
    %98 = math.tanh %97 : vector<8x32xf32>
    %99 = tpu.concatenate %97, %98 in 1 : vector<8x32xf32>, vector<8x32xf32> -> vector<8x64xf32>
    %100 = vector.extract_strided_slice %99 {offsets = [4, 0], sizes = [4, 64], strides = [1, 1]} : vector<8x64xf32> to vector<4x64xf32>
    %101 = vector.extract_strided_slice %99 {offsets = [0, 0], sizes = [4, 64], strides = [1, 1]} : vector<8x64xf32> to vector<4x64xf32>
    %102 = tpu.concatenate %100, %101 in 0 : vector<4x64xf32>, vector<4x64xf32> -> vector<8x64xf32>
    %103 = tpu.concatenate %99, %102 in 1 : vector<8x64xf32>, vector<8x64xf32> -> vector<8x128xf32>
    %cst_30 = arith.constant dense<0.000000e+00> : vector<8x128xf32>
    %104 = tpu.matmul %103, %36, %cst_30 {dimension_numbers = #tpu.dot_dimension_numbers<[1], [0], [0], [1], [0, 0, 1, 1], [], []>} : vector<8x128xf32>, vector<128x128xf32>, vector<8x128xf32> -> vector<8x128xf32>
    %105 = vector.broadcast %37 : vector<1x128xf32> to vector<8x128xf32>
    %106 = arith.addf %104, %105 : vector<8x128xf32>
    %cst_31 = arith.constant 5.000000e-01 : f32
    %107 = vector.broadcast %cst_31 : f32 to vector<8x128xf32>
    %108 = arith.mulf %107, %106 : vector<8x128xf32>
    %109 = arith.select %40, %108, %106 : vector<8x128xi1>, vector<8x128xf32>
    %110 = math.tanh %109 : vector<8x128xf32>
    %cst_32 = arith.constant 5.000000e-01 : f32
    %111 = vector.broadcast %cst_32 : f32 to vector<8x128xf32>
    %112 = arith.mulf %111, %110 : vector<8x128xf32>
    %cst_33 = arith.constant 5.000000e-01 : f32
    %113 = vector.broadcast %cst_33 : f32 to vector<8x128xf32>
    %114 = arith.addf %112, %113 : vector<8x128xf32>
    %115 = arith.select %40, %114, %110 : vector<8x128xi1>, vector<8x128xf32>
    %116 = vector.extract_strided_slice %115 {offsets = [0, 0], sizes = [8, 32], strides = [1, 1]} : vector<8x128xf32> to vector<8x32xf32>
    %117 = vector.extract_strided_slice %115 {offsets = [0, 32], sizes = [8, 32], strides = [1, 1]} : vector<8x128xf32> to vector<8x32xf32>
    %118 = vector.extract_strided_slice %115 {offsets = [0, 64], sizes = [8, 32], strides = [1, 1]} : vector<8x128xf32> to vector<8x32xf32>
    %119 = vector.extract_strided_slice %115 {offsets = [0, 96], sizes = [8, 32], strides = [1, 1]} : vector<8x128xf32> to vector<8x32xf32>
    %120 = vector.extract_strided_slice %103 {offsets = [0, 0], sizes = [8, 32], strides = [1, 1]} : vector<8x128xf32> to vector<8x32xf32>
    %121 = vector.extract_strided_slice %103 {offsets = [0, 64], sizes = [8, 32], strides = [1, 1]} : vector<8x128xf32> to vector<8x32xf32>
    %122 = arith.mulf %116, %119 : vector<8x32xf32>
    %123 = arith.mulf %117, %120 : vector<8x32xf32>
    %124 = arith.addf %122, %123 : vector<8x32xf32>
    %125 = arith.mulf %118, %121 : vector<8x32xf32>
    %126 = arith.addf %124, %125 : vector<8x32xf32>
    %127 = math.tanh %126 : vector<8x32xf32>
    %128 = tpu.concatenate %126, %127 in 1 : vector<8x32xf32>, vector<8x32xf32> -> vector<8x64xf32>
    %129 = vector.extract_strided_slice %128 {offsets = [0, 0], sizes = [1, 64], strides = [1, 1]} : vector<8x64xf32> to vector<1x64xf32>
    %c0_34 = arith.constant 0 : index
    %c0_35 = arith.constant 0 : index
    %c0_36 = arith.constant 0 : index
    %130 = vector.load %arg8[%c0_34, %c0_35, %c0_36] : memref<1x1x64xf32, #tpu.memory_space<vmem>>, vector<1x1x64xf32>
    %131 = vector.shape_cast %130 : vector<1x1x64xf32> to vector<1x64xf32>
    %132 = vector.shape_cast %129 : vector<1x64xf32> to vector<1x1x64xf32>
    tpu.vector_store %arg8[%c0_34, %c0_35, %c0_36], %132 {strides = array<i32>} : memref<1x1x64xf32, #tpu.memory_space<vmem>>, vector<1x1x64xf32>,
    return
  }
  func.func @transform_0(%arg0: i32) -> (i32, i32, i32) {
    %c0_i32 = arith.constant 0 : i32
    %c0_i32_0 = arith.constant 0 : i32
    %c0_i32_1 = arith.constant 0 : i32
    return %arg0, %c0_i32, %c0_i32_0 : i32, i32, i32
  }
  func.func @transform_1(%arg0: i32) -> (i32, i32) {
    %c0_i32 = arith.constant 0 : i32
    %c0_i32_0 = arith.constant 0 : i32
    %c0_i32_1 = arith.constant 0 : i32
    return %c0_i32, %c0_i32_0 : i32, i32
  }
  func.func @transform_2(%arg0: i32) -> (i32, i32) {
    %c0_i32 = arith.constant 0 : i32
    %c0_i32_0 = arith.constant 0 : i32
    %c0_i32_1 = arith.constant 0 : i32
    return %c0_i32, %c0_i32_0 : i32, i32
  }
  func.func @transform_3(%arg0: i32) -> (i32, i32) {
    %c0_i32 = arith.constant 0 : i32
    %c0_i32_0 = arith.constant 0 : i32
    %c0_i32_1 = arith.constant 0 : i32
    return %c0_i32, %c0_i32_0 : i32, i32
  }
  func.func @transform_4(%arg0: i32) -> (i32, i32) {
    %c0_i32 = arith.constant 0 : i32
    %c0_i32_0 = arith.constant 0 : i32
    %c0_i32_1 = arith.constant 0 : i32
    return %c0_i32, %c0_i32_0 : i32, i32
  }
  func.func @transform_5(%arg0: i32) -> (i32, i32) {
    %c0_i32 = arith.constant 0 : i32
    %c0_i32_0 = arith.constant 0 : i32
    %c0_i32_1 = arith.constant 0 : i32
    return %c0_i32, %c0_i32_0 : i32, i32
  }
  func.func @transform_6(%arg0: i32) -> (i32, i32, i32) {
    %c0_i32 = arith.constant 0 : i32
    %c0_i32_0 = arith.constant 0 : i32
    %c0_i32_1 = arith.constant 0 : i32
    return %arg0, %c0_i32, %c0_i32_0 : i32, i32, i32
  }
  func.func @transform_7(%arg0: i32) -> (i32, i32, i32) {
    %c0_i32 = arith.constant 0 : i32
    %c0_i32_0 = arith.constant 0 : i32
    %c0_i32_1 = arith.constant 0 : i32
    return %arg0, %c0_i32, %c0_i32_0 : i32, i32, i32
  }
}

</mosaic_0001>

<bundles_post_ra>
// kernel: encode.1
= control target key start
LH: loop header
LB: loop body
LE: loop exit
PB: predicated region body
PF: predicated region fallthrough
CT: control target
= control target key end

     0   :  { %13 = vsyncpa [#allocation3], 0  ;;  %s1036_s0 = inlined_call_operand.vmem [shape: s32[2,8,1], index: 0, kind: input, shape index: {}]   ;;  %s1037_s1 = inlined_call_operand.vmem [shape: f32[16,32], index: 1, kind: input, shape index: {}]   ;;  %s1038_s2 = inlined_call_operand.hbm [shape: f32[32,64], index: 2, kind: input, shape index: {}]   ;;  %s1039_s3 = inlined_call_operand.vmem [shape: f32[1,64], index: 3, kind: input, shape index: {}]   ;;  %s1040_s4 = inlined_call_operand.hbm [shape: f32[128,128], index: 4, kind: input, shape index: {}]   ;;  %s1041_s5 = inlined_call_operand.vmem [shape: f32[1,128], index: 5, kind: input, shape index: {}]   ;;  %s1042_s6 = inlined_call_operand.vmem [shape: f32[2,10,32], index: 6, kind: output, shape index: {0}]   ;;  %s1043_s7 = inlined_call_operand.vmem [shape: f32[2,1,64], index: 7, kind: output, shape index: {1}]  }
   0x1   :  { %14 = vsyncpa [#allocation5], 0  ;;  %s916_s24 = smov 0  }
   0x2 LB: > { %s222_s27 = sshll.u32 %s1038_s2, 4  ;;  %s720_s28 = sadd.s32 4294967295, %s865_s24   ;;  %s865_s24 = sphi %s916_s24, %s20_s24   ;;  %s223_s27 = int_to_ptr.hbm [resolvable:$true] %s222_s27 }
   0x3   : > { %p722_p0 = scmp.ge.s32.totalorder %s865_s24, 1  ;;  %p208_p1 = scmp.lt.s32.totalorder %s865_s24, 3 }
   0x4   : > { %p753_p2 = scmp.eq.s32.totalorder %s720_s28, 0  ;;  %s867_s30 = smov [#allocation2]  }
   0x5   : > { %p927_p3 = pnand %p722_p0, %p208_p1  ;;  %s224_s8 = sshll.u32 %s867_s30, 4  ;;  %s225_s8 = int_to_ptr.vmem [resolvable:$true] %s224_s8 }
   0x6   : > { %s239_s11 = sshll.u32 %s1040_s4, 4  ;;  %s868_s12 = smov [#allocation4]   ;;  %s240_s11 = int_to_ptr.hbm [resolvable:$true] %s239_s11 }
   0x7   : > { %p746_p4 = pneg %p927_p3  ;;  %s241_s13 = sshll.u32 %s868_s12, 4  ;;  %s242_s13 = int_to_ptr.vmem [resolvable:$true] %s241_s13 }
   0x8   : > { %s869_s14 = smov 128   ;;  %s870_s15 = smov 8  }
   0x9   : > { %p747_p5 = pnand %p753_p2, %p746_p4  ;;  %267 = sbr.rel (%p927_p3) target bundleno = 2000 (0x7d0), region = 44 }
   0xb   : > { %749 = dma.hbm_to_vmem [thread:$0]  (!%p747_p5), %s223_s27, 512, %s225_s8, [#allocation3], %s869_s14, %s869_s14, %s870_s15  }
   0xc   : > { %752 = dma.hbm_to_vmem [thread:$0]  (!%p747_p5), %s240_s11, 2048, %s242_s13, [#allocation5], %s869_s14, %s869_s14, %s870_s15  }
   0xe   : > { %856 = dma.done.wait (%p753_p2), [#allocation3], 512  }
   0xf   : > { %858 = vsyncadd (%p753_p2), [#allocation3], 4294966784 }
  0x10   : > { %860 = dma.done.wait (%p753_p2), [#allocation5], 2048  }
  0x11   : > { %862 = vsyncadd (%p753_p2), [#allocation5], 4294965248  ;;  %p307_p6 = scmp.lt.s32.totalorder %s720_s28, 1  ;;  %v871_v0 = vmov 0   ;;  %vm402_vm0 = vcmask 254976   ;;  %v872_v1 = vmov 0.0   ;;  %v319_v9 = vlaneseq }
  0x12   : > { %774 = vset.pattern.permute.xlu0 %v871_v0  ;;  %v329_v3 = vld [vmem:[%s1037_s1 + $0x8] sm:$0xff]  ;;  %v328_v4 = vld [vmem:[%s1037_s1] sm:$0xff]  ;;  %v357_v5 = vld [vmem:[#allocation2 + $0x18] sm:$0xff]  ;;  %vm330_vm1 = vcmask 130048   ;;  %vm362_vm3 = vcmask 261120   ;;  %s873_s9 = smov 32  }
  0x13   : > { %s1046_s28 = smov (!%p307_p6, %s720_s28), 1  ;;  %348 = vmatpush.msra.mxu1 %v329_v3  ;;  %v356_v6 = vld [vmem:[#allocation2 + $0x10] sm:$0xff]  ;;  %v355_v7 = vld [vmem:[#allocation2 + $0x8] sm:$0xff]  ;;  %v354_v8 = vld [vmem:[#allocation2] sm:$0xff]  ;;  %v962_v10 = vand.u32 127, %v319_v9  ;;  %s874_s10 = smov 64  }
  0x14   : > { %s729_s16 = sshll.u32 %s1046_s28, 3  ;;  %s737_s17 = sshll.u32 %s1046_s28, 4  ;;  %v775_v14 = vld [vmem:[%s1039_s3] ss:$0 sm:$0xff]  ;;  %v419_v20 = vld [vmem:[#allocation4 + $0x78] sm:$0xff]  ;;  %v418_v21 = vld [vmem:[#allocation4 + $0x70] sm:$0xff] }
  0x15   : > { %s310_s20 = scalar_lea.vmem %s1036_s0, %s729_s16  ;;  %s953_s23 = scalar_lea.vmem %s1042_s6, %s737_s17  ;;  %349 = vmatpush.msra.mxu1 %v328_v4  ;;  %vm386_vm4 = vcmp.ge.s32.totalorder %v962_v10, 32  ;;  %437 = vmatpush.msra.mxu2 %v419_v20  ;;  %v417_v22 = vld [vmem:[#allocation4 + $0x68] sm:$0xff]  ;;  %v416_v23 = vld [vmem:[#allocation4 + $0x60] sm:$0xff]  ;;  %v415_v24 = vld [vmem:[#allocation4 + $0x58] sm:$0xff]  ;;  %vm432_vm5 = vcmask 523264   ;;  %vm421_vm6 = vcmp.lt.s32.totalorder %v962_v10, 96 }
  0x16   : > { %403 = vst.msk [vmem:[%s953_s23 + $0x8] sm:$0x3] %vm402_vm0, %v872_v1  ;;  %v321_v2 = vld [vmem:[%s310_s20] sm:$0xff]  ;;  %500 = vmatpush.msra.mxu3 %v419_v20  ;;  %563 = vmatpush.msra.mxu0 %v419_v20  ;;  %v414_v25 = vld [vmem:[#allocation4 + $0x50] sm:$0xff]  ;;  %v413_v26 = vld [vmem:[#allocation4 + $0x48] sm:$0xff]  ;;  %s875_s13 = smov 96   ;;  %s318_s16 = scalar_lea.vmem %s1043_s7, %s1046_s28 }
  0x17   : > { %323 = vperm.xlu0 %774, %v321_v2   ;;  %378 = vmatpush.msrb.mxu1 %v357_v5  ;;  %v412_v27 = vld [vmem:[#allocation4 + $0x40] sm:$0xff]  ;;  %v411_v28 = vld [vmem:[#allocation4 + $0x38] sm:$0xff]  ;;  %v410_v29 = vld [vmem:[#allocation4 + $0x30] sm:$0xff]  ;;  %vm616_vm7 = vcmask 516096  }
  0x18   : > { %438 = vmatpush.msra.mxu2 %v418_v21  ;;  %501 = vmatpush.msra.mxu3 %v418_v21  ;;  %v409_v30 = vld [vmem:[#allocation4 + $0x28] sm:$0xff]  ;;  %v408_v31 = vld [vmem:[#allocation4 + $0x20] sm:$0xff]  ;;  %v407_v33 = vld [vmem:[#allocation4 + $0x18] sm:$0xff] }
  0x19   : > { %379 = vmatpush.msrb.mxu1 %v356_v6  ;;  %564 = vmatpush.msra.mxu0 %v418_v21  ;;  %v406_v34 = vld [vmem:[#allocation4 + $0x10] sm:$0xff]  ;;  %v405_v37 = vld [vmem:[#allocation4 + $0x8] sm:$0xff]  ;;  %v404_v41 = vld [vmem:[#allocation4] sm:$0xff] }
  0x1a   : > { %439 = vmatpush.msra.mxu2 %v417_v22  ;;  %502 = vmatpush.msra.mxu3 %v417_v22  ;;  %v986_v44 = vld [vmem:[%s1041_s5] ss:$0 sm:$0xff] }
  0x1b   : > { %380 = vmatpush.msrb.mxu1 %v355_v7  ;;  %565 = vmatpush.msra.mxu0 %v417_v22 }
  0x1c   : > { %440 = vmatpush.msra.mxu2 %v416_v23  ;;  %503 = vmatpush.msra.mxu3 %v416_v23 }
  0x1d   : > { %381 = vmatpush.msrb.mxu1 %v354_v8  ;;  %566 = vmatpush.msra.mxu0 %v416_v23 }
  0x1e   : > { %441 = vmatpush.msra.mxu2 %v415_v24  ;;  %504 = vmatpush.msra.mxu3 %v415_v24 }
  0x1f   : > { %567 = vmatpush.msra.mxu0 %v415_v24 }
  0x20   : > { %442 = vmatpush.msra.mxu2 %v414_v25  ;;  %505 = vmatpush.msra.mxu3 %v414_v25 }
  0x21   : > { %568 = vmatpush.msra.mxu0 %v414_v25 }
  0x22   : > { %443 = vmatpush.msra.mxu2 %v413_v26  ;;  %506 = vmatpush.msra.mxu3 %v413_v26 }
  0x23   : > { %569 = vmatpush.msra.mxu0 %v413_v26 }
  0x24   : > { %444 = vmatpush.msra.mxu2 %v412_v27  ;;  %507 = vmatpush.msra.mxu3 %v412_v27 }
  0x25   : > { %570 = vmatpush.msra.mxu0 %v412_v27 }
  0x26   : > { %445 = vmatpush.msra.mxu2 %v411_v28  ;;  %508 = vmatpush.msra.mxu3 %v411_v28 }
  0x27   : > { %571 = vmatpush.msra.mxu0 %v411_v28 }
  0x28   : > { %446 = vmatpush.msra.mxu2 %v410_v29  ;;  %509 = vmatpush.msra.mxu3 %v410_v29 }
  0x29   : > { %572 = vmatpush.msra.mxu0 %v410_v29 }
  0x2a   : > { %447 = vmatpush.msra.mxu2 %v409_v30  ;;  %510 = vmatpush.msra.mxu3 %v409_v30 }
  0x2b   : > { %573 = vmatpush.msra.mxu0 %v409_v30 }
  0x2c   : > { %448 = vmatpush.msra.mxu2 %v408_v31  ;;  %511 = vmatpush.msra.mxu3 %v408_v31 }
  0x2d   : > { %574 = vmatpush.msra.mxu0 %v408_v31 }
  0x2e   : > { %449 = vmatpush.msra.mxu2 %v407_v33  ;;  %512 = vmatpush.msra.mxu3 %v407_v33 }
  0x2f   : > { %575 = vmatpush.msra.mxu0 %v407_v33 }
  0x30   : > { %450 = vmatpush.msra.mxu2 %v406_v34  ;;  %513 = vmatpush.msra.mxu3 %v406_v34 }
  0x31   : > { %576 = vmatpush.msra.mxu0 %v406_v34 }
  0x32   : > { %451 = vmatpush.msra.mxu2 %v405_v37  ;;  %514 = vmatpush.msra.mxu3 %v405_v37 }
  0x33   : > { %577 = vmatpush.msra.mxu0 %v405_v37 }
  0x34   : > { %452 = vmatpush.msra.mxu2 %v404_v41  ;;  %515 = vmatpush.msra.mxu3 %v404_v41 }
  0x35   : > { %578 = vmatpush.msra.mxu0 %v404_v41 }
  0x89   : > { %v324_v11 = vpop.permute.xlu0 %323 }
  0x8a   : > { %vm325_vm2 = vcmp.eq.s32.totalorder %v324_v11, %v962_v10 }
  0x8b   : > { %v732_v12 = vsel %vm325_vm2, 1.0, %v872_v1 }
  0x8c   : > { %733 = vmatmul.msk.f32.vlgmr.msra.gmra.mxu1 %vm330_vm1, %v732_v12 }
 0x109   : > { %v351_v13 = vpop.f32.mrf.mxu1 }
 0x10a   : > { %734 = vmatmul.msk.f32.vlgmr.msrb.gmra.mxu1 %vm362_vm3, %v351_v13 }
 0x187   : > { %v383_v15 = vpop.f32.mrf.mxu1 }
 0x188   : > { %v969_v16 = vadd.f32 %v775_v14, %v383_v15 }
 0x18a   : > { %v387_v17 = vmul.f32 0.5, %v969_v16 }
 0x18c   : > { %v388_v18 = vsel %vm386_vm4, %v387_v17, %v969_v16 }
 0x18d   : > { %777 = vtanh.f32 %v388_v18 }
 0x193   : > { %v778_v19 = vpop.eup %777 }
 0x194   : > { %393 = vrot.lane.b32.xlu0 %v778_v19, %s873_s9  ;;  %v390_v32 = vmul.f32 0.5, %v778_v19 }
 0x196   : > { %v391_v35 = vadd.f32 0.5, %v390_v32 }
 0x206   : > { %v394_v36 = vpop.permute.xlu0 %393 }
 0x207   : > { %v975_v38 = vmul.f32 %v394_v36, %v391_v35 }
 0x209   : > { %v422_v39 = vsel %vm362_vm3, %v969_v16, %v975_v38 }
 0x20a   : > { %v424_v40 = vrot.slane %v422_v39, 1 }
 0x20c   : > { %429 = vrot.lane.b32.xlu1 %v424_v40, %s874_s10 }
 0x27e   : > { %v430_v42 = vpop.permute.xlu1 %429 }
 0x27f   : > { %v433_v43 = vsel %vm432_vm5, %v422_v39, %v430_v42 }
 0x280   : > { %469 = vrot.lane.b32.xlu1 %v433_v43, %s873_s9  ;;  %453 = vmatmul.f32.vlgmr.msra.gmra.mxu2 %v433_v43 }
 0x2f2   : > { %v470_v54 = vpop.permute.xlu1 %469 }
 0x303   : > { %v454_v45 = vpop.f32.mrf.mxu2 }
 0x304   : > { %v455_v46 = vadd.f32 %v986_v44, %v454_v45 }
 0x306   : > { %v457_v47 = vmul.f32 0.5, %v455_v46 }
 0x308   : > { %v458_v48 = vsel %vm421_vm6, %v457_v47, %v455_v46 }
 0x309   : > { %779 = vtanh.f32 %v458_v48 }
 0x30f   : > { %v780_v49 = vpop.eup %779 }
 0x310   : > { %v460_v50 = vmul.f32 0.5, %v780_v49 }
 0x312   : > { %v461_v51 = vadd.f32 0.5, %v460_v50 }
 0x314   : > { %v462_v52 = vsel %vm421_vm6, %v461_v51, %v780_v49 }
 0x315   : > { %464 = vrot.lane.b32.xlu2 %v462_v52, %s873_s9  ;;  %v478_v53 = vmul.f32 %v462_v52, %v433_v43  ;;  %v472_v55 = vmul.f32 %v470_v54, %v462_v52 }
 0x317   : > { %480 = vrot.lane.b32.xlu0 %v478_v53, %s874_s10 }
 0x31d   : > { %474 = vrot.lane.b32.xlu2 %v472_v55, %s875_s13 }
 0x36f   : > { %v465_v56 = vpop.permute.xlu2 %464 }
 0x370   : > { %v467_v58 = vmul.f32 %v465_v56, %v462_v52 }
 0x377   : > { %v475_v57 = vpop.permute.xlu2 %474 }
 0x378   : > { %v477_v59 = vadd.f32 %v475_v57, %v467_v58 }
 0x389   : > { %v481_v60 = vpop.permute.xlu0 %480 }
 0x38a   : > { %v483_v61 = vadd.f32 %v481_v60, %v477_v59 }
 0x38c   : > { %781 = vtanh.f32 %v483_v61 }
 0x392   : > { %v782_v62 = vpop.eup %781 }
 0x393   : > { %486 = vrot.lane.b32.xlu1 %v782_v62, %s873_s9 }
 0x405   : > { %v487_v63 = vpop.permute.xlu1 %486 }
 0x406   : > { %v489_v0 = vsel %vm362_vm3, %v483_v61, %v487_v63 }
 0x407   : > { %v491_v1 = vrot.slane %v489_v0, 2 }
 0x409   : > { %496 = vrot.lane.b32.xlu2 %v491_v1, %s874_s10 }
 0x463   : > { %v497_v2 = vpop.permute.xlu2 %496 }
 0x464   : > { %v499_v3 = vsel %vm432_vm5, %v489_v0, %v497_v2 }
 0x465   : > { %532 = vrot.lane.b32.xlu0 %v499_v3, %s873_s9  ;;  %516 = vmatmul.f32.vlgmr.msra.gmra.mxu3 %v499_v3 }
 0x4d7   : > { %v533_v12 = vpop.permute.xlu0 %532 }
 0x4e8   : > { %v517_v4 = vpop.f32.mrf.mxu3 }
 0x4e9   : > { %v518_v5 = vadd.f32 %v986_v44, %v517_v4 }
 0x4eb   : > { %v520_v6 = vmul.f32 0.5, %v518_v5 }
 0x4ed   : > { %v521_v7 = vsel %vm421_vm6, %v520_v6, %v518_v5 }
 0x4ee   : > { %783 = vtanh.f32 %v521_v7 }
 0x4f4   : > { %v784_v8 = vpop.eup %783 }
 0x4f5   : > { %v523_v9 = vmul.f32 0.5, %v784_v8 }
 0x4f7   : > { %v524_v11 = vadd.f32 0.5, %v523_v9 }
 0x4f9   : > { %v525_v13 = vsel %vm421_vm6, %v524_v11, %v784_v8 }
 0x4fa   : > { %527 = vrot.lane.b32.xlu1 %v525_v13, %s873_s9  ;;  %v541_v14 = vmul.f32 %v525_v13, %v499_v3  ;;  %v535_v15 = vmul.f32 %v533_v12, %v525_v13 }
 0x4fc   : > { %543 = vrot.lane.b32.xlu0 %v541_v14, %s874_s10  ;;  %537 = vrot.lane.b32.xlu2 %v535_v15, %s875_s13 }
 0x556   : > { %v538_v18 = vpop.permute.xlu2 %537 }
 0x56c   : > { %v528_v16 = vpop.permute.xlu1 %527 }
 0x56d   : > { %v530_v17 = vmul.f32 %v528_v16, %v525_v13 }
 0x56e   : > { %v544_v20 = vpop.permute.xlu0 %543 }
 0x56f   : > { %v540_v19 = vadd.f32 %v538_v18, %v530_v17 }
 0x571   : > { %v546_v21 = vadd.f32 %v544_v20, %v540_v19 }
 0x573   : > { %785 = vtanh.f32 %v546_v21 }
 0x579   : > { %v786_v22 = vpop.eup %785 }
 0x57a   : > { %549 = vrot.lane.b32.xlu1 %v786_v22, %s873_s9 }
 0x5ec   : > { %v550_v23 = vpop.permute.xlu1 %549 }
 0x5ed   : > { %v552_v24 = vsel %vm362_vm3, %v546_v21, %v550_v23 }
 0x5ee   : > { %v554_v25 = vrot.slane %v552_v24, 4 }
 0x5f0   : > { %559 = vrot.lane.b32.xlu2 %v554_v25, %s874_s10 }
 0x64a   : > { %v560_v26 = vpop.permute.xlu2 %559 }
 0x64b   : > { %v562_v27 = vsel %vm432_vm5, %v552_v24, %v560_v26 }
 0x64c   : > { %595 = vrot.lane.b32.xlu0 %v562_v27, %s873_s9  ;;  %579 = vmatmul.f32.vlgmr.msra.gmra.mxu0 %v562_v27 }
 0x6be   : > { %v596_v35 = vpop.permute.xlu0 %595 }
 0x6c9   : > { %v580_v28 = vpop.f32.mrf.mxu0 }
 0x6ca   : > { %v581_v29 = vadd.f32 %v986_v44, %v580_v28 }
 0x6cc   : > { %v583_v30 = vmul.f32 0.5, %v581_v29 }
 0x6ce   : > { %v584_v31 = vsel %vm421_vm6, %v583_v30, %v581_v29 }
 0x6cf   : > { %787 = vtanh.f32 %v584_v31 }
 0x6d5   : > { %v788_v32 = vpop.eup %787 }
 0x6d6   : > { %v586_v33 = vmul.f32 0.5, %v788_v32 }
 0x6d8   : > { %v587_v34 = vadd.f32 0.5, %v586_v33 }
 0x6da   : > { %v588_v36 = vsel %vm421_vm6, %v587_v34, %v788_v32 }
 0x6db   : > { %590 = vrot.lane.b32.xlu1 %v588_v36, %s873_s9  ;;  %v604_v37 = vmul.f32 %v588_v36, %v562_v27  ;;  %v598_v39 = vmul.f32 %v596_v35, %v588_v36 }
 0x6dd   : > { %606 = vrot.lane.b32.xlu0 %v604_v37, %s874_s10  ;;  %600 = vrot.lane.b32.xlu2 %v598_v39, %s875_s13 }
 0x6e5   : > { %398 = vrot.lane.b32.xlu2 %v975_v38, %s875_s13 }
 0x737   : > { %v601_v40 = vpop.permute.xlu2 %600 }
 0x73f   : > { %v399_v41 = vpop.permute.xlu2 %398 }
 0x740   : > { %401 = vst.msk [vmem:[%s953_s23] sm:$0xff] %vm362_vm3, %v399_v41 }
 0x74d   : > { %v591_v42 = vpop.permute.xlu1 %590 }
 0x74e   : > { %v593_v43 = vmul.f32 %v591_v42, %v588_v36 }
 0x74f   : > { %v607_v44 = vpop.permute.xlu0 %606 }
 0x750   : > { %v603_v10 = vadd.f32 %v601_v40, %v593_v43 }
 0x752   : > { %v609_v45 = vadd.f32 %v607_v44, %v603_v10 }
 0x754   : > { %789 = vtanh.f32 %v609_v45 }
 0x75a   : > { %v790_v46 = vpop.eup %789 }
 0x75b   : > { %612 = vrot.lane.b32.xlu1 %v790_v46, %s873_s9 }
 0x7cd   : > { %v613_v47 = vpop.permute.xlu1 %612 }
 0x7ce   : > { %v615_v38 = vsel %vm362_vm3, %v609_v45, %v613_v47 }
 0x7cf   : > { %617 = vst.msk [vmem:[%s318_s16] sm:$0x1] %vm616_vm7, %v615_v38 }
 0x7d0 PF: > { %s20_s24 = sadd.s32 1, %s865_s24  }
 0x7d1   : > { %p17_p7 = scmp.ge.s32.totalorder %s20_s24, 4  }
 0x7d3   :  { %19 = sbr.rel (!%p17_p7) target bundleno = 2 (0x2), region = 95 }
 0x7d8   :  { %651 = vsyncpa [#allocation3], 1 }
 0x7d9   :  { %653 = vsyncpa [#allocation3 + $0x1], 1 }
 0x7da   :  { %654 = vsyncpa [#allocation5], 1 }

</bundles_post_ra>
